<compile_context>
chip_gen: v5e
topology: v5e:2x2
jax: 0.10.0
libtpu: 0.0.40
codegen_flags: <defaults>
</compile_context>

<pallas_src>
import jax
import jax.numpy as jnp
from jax.experimental import pallas as pl
from jax.experimental.pallas import tpu as pltpu


# ---------------------------------------------------------------------------
# Fused Conv2d(2,2,s=1,p=2) + ReLU + MaxPool2d(2,2) kernel (one pooled row / step)
# ---------------------------------------------------------------------------
def _make_fused_block_kernel(Wq, Cin, Cout, use_mxu):
    K = 4 * Cin  # kh*kw*Cin folded contraction

    def kernel(xe0_ref, xe1_ref, xe2_ref, xo0_ref, xo1_ref, xo2_ref,
               w_ref, b_ref, o_ref):
        # xe*_ref: (Wq+1, Cin) even padded columns of padded rows 2r, 2r+1, 2r+2
        # xo*_ref: (Wq,   Cin) odd  padded columns of the same rows
        # w_ref  : (4*Cin, Cout)  folded (kh, kw, Cin) -> K weights
        # b_ref  : (1, Cout)
        # o_ref  : (Wq, Cout)     pooled output row r
        xe0 = xe0_ref[...]; xe1 = xe1_ref[...]; xe2 = xe2_ref[...]
        xo0 = xo0_ref[...]; xo1 = xo1_ref[...]; xo2 = xo2_ref[...]

        # im2col patches for the 4 conv outputs inside each 2x2 pool window.
        # Channel order per row = tap(0,0),(0,1),(1,0),(1,1) blocks of Cin,
        # matching the weight fold. All slices are contiguous; the even/odd
        # column split done in the wrapper absorbs the stride-2 pool pattern.
        g00 = jnp.concatenate([xe0[:Wq], xo0[:Wq], xe1[:Wq], xo1[:Wq]], axis=-1)
        g01 = jnp.concatenate([xo0[:Wq], xe0[1:Wq + 1], xo1[:Wq], xe1[1:Wq + 1]], axis=-1)
        g10 = jnp.concatenate([xe1[:Wq], xo1[:Wq], xe2[:Wq], xo2[:Wq]], axis=-1)
        g11 = jnp.concatenate([xo1[:Wq], xe1[1:Wq + 1], xo2[:Wq], xe2[1:Wq + 1]], axis=-1)
        patch = jnp.concatenate([g00, g01, g10, g11], axis=0)        # (4*Wq, K)

        w = w_ref[...]
        if use_mxu:
            # single folded-K matmul on the MXU
            acc = jnp.dot(patch, w, preferred_element_type=jnp.float32)
        else:
            # Cin == 1 first layer: K == 4 is degenerate on the MXU -> VPU path
            acc = jnp.zeros((4 * Wq, Cout), jnp.float32)
            for k in range(K):
                acc = acc + patch[:, k:k + 1] * w[k:k + 1, :]

        acc = acc + b_ref[...]
        acc = jnp.maximum(acc, 0.0)                                   # ReLU
        # 2x2 max-pool: elementwise max of the 4 conv outputs per window.
        pooled = jnp.maximum(jnp.maximum(acc[0:Wq], acc[Wq:2 * Wq]),
                             jnp.maximum(acc[2 * Wq:3 * Wq], acc[3 * Wq:4 * Wq]))
        # NOTE: final layer Cout=2 gives a lane-sparse store; output is tiny so
        # the transposed/lane-dense layout was not worth the extra plumbing here.
        o_ref[...] = pooled.astype(o_ref.dtype)

    return kernel


# ---------------------------------------------------------------------------
# One conv block: Conv2d(k=2, s=1, p=2) -> ReLU -> MaxPool2d(2, 2)   (fused)
# ---------------------------------------------------------------------------
def conv_relu_maxpool_block(x, w, b, *, padding=2):
    # x: (N, H, W, Cin) NHWC ; w: (Cout, Cin, kh, kw) (PyTorch OIHW) ; b: (Cout,)
    N, H, W, Cin = x.shape
    Cout, _, kh, kw = w.shape
    assert (kh, kw) == (2, 2), "kernel specialised for kernel_size=2"
    Ho = H + 2 * padding - kh + 1
    Wo = W + 2 * padding - kw + 1
    Hq, Wq = Ho // 2, Wo // 2                       # MaxPool2d(2,2), floor mode

    xp = jnp.pad(x, ((0, 0), (padding, padding), (padding, padding), (0, 0)))
    # Even/odd padded-column split (XLA side, ~1x input bytes) so all in-kernel
    # accesses are contiguous: conv col 2q+b reads even col q(+b) / odd col q.
    xe = xp[:, :, 0:2 * Wq + 1:2, :]                # (N, Hpad, Wq+1, Cin)
    xo = xp[:, :, 1:2 * Wq:2, :]                    # (N, Hpad, Wq,   Cin)

    K = kh * kw * Cin
    wk = jnp.transpose(w, (2, 3, 1, 0)).reshape(K, Cout)   # (4*Cin, Cout)
    b2 = b.reshape(1, Cout)

    def row_spec(width, d):
        return pl.BlockSpec((None, None, width, Cin),
                            lambda n, r: (n, 2 * r + d, 0, 0))

    kernel = _make_fused_block_kernel(Wq, Cin, Cout, use_mxu=(Cin >= 8))

    return pl.pallas_call(
        kernel,
        out_shape=jax.ShapeDtypeStruct((N, Hq, Wq, Cout), jnp.float32),
        grid=(N, Hq),
        in_specs=[row_spec(Wq + 1, 0), row_spec(Wq + 1, 1), row_spec(Wq + 1, 2),
                  row_spec(Wq, 0), row_spec(Wq, 1), row_spec(Wq, 2),
                  pl.BlockSpec((K, Cout), lambda n, r: (0, 0)),
                  pl.BlockSpec((1, Cout), lambda n, r: (0, 0))],
        out_specs=pl.BlockSpec((None, None, Wq, Cout), lambda n, r: (n, r, 0, 0)),
        compiler_params=pltpu.CompilerParams(
            dimension_semantics=("parallel", "parallel")),
    )(xe, xe, xe, xo, xo, xo, wk, b2)


# ---------------------------------------------------------------------------
# ClassicalBackbone: conv_block(1,32) -> conv_block(32,64)
#                    -> [conv_block(64,64)] * nb_q_conv_layer
#                    -> conv_block(64, out_channels)
# ---------------------------------------------------------------------------
def init_params(key, kernel_size=2, nb_q_conv_layer=0, out_channels=2):
    dims = [(1, 32), (32, 64)] + [(64, 64)] * nb_q_conv_layer + [(64, out_channels)]
    params = []
    for cin, cout in dims:
        key, kw_key, kb_key = jax.random.split(key, 3)
        fan_in = cin * kernel_size * kernel_size
        bound = 1.0 / float(fan_in) ** 0.5          # PyTorch-style uniform init
        w = jax.random.uniform(kw_key, (cout, cin, kernel_size, kernel_size),
                               jnp.float32, -bound, bound)
        b = jax.random.uniform(kb_key, (cout,), jnp.float32, -bound, bound)
        params.append((w, b))
    return params


def classical_backbone_forward(x_nchw, params):
    # layout: NCHW in / NCHW out (matches PyTorch); NHWC inside.
    x = jnp.transpose(x_nchw, (0, 2, 3, 1))
    for w, b in params:
        x = conv_relu_maxpool_block(x, w, b, padding=2)
    return jnp.transpose(x, (0, 3, 1, 2))


# ---------------------------------------------------------------------------
# Pure-JAX reference for correctness checking
# ---------------------------------------------------------------------------
def _ref_forward(x_nchw, params):
    x = x_nchw
    for w, b in params:
        y = jax.lax.conv_general_dilated(
            x, w, window_strides=(1, 1), padding=((2, 2), (2, 2)),
            dimension_numbers=('NCHW', 'OIHW', 'NCHW'))
        y = y + b.reshape(1, -1, 1, 1)
        y = jnp.maximum(y, 0.0)
        y = jax.lax.reduce_window(y, -jnp.inf, jax.lax.max,
                                  window_dimensions=(1, 1, 2, 2),
                                  window_strides=(1, 1, 2, 2),
                                  padding='VALID')
        x = y
    return x


if __name__ == "__main__":
    key = jax.random.PRNGKey(0)
    kx, kp = jax.random.split(key)

    # Module builds conv_block(1, 32) first -> input has 1 channel.
    x = jax.random.normal(kx, (2, 1, 16, 16), jnp.float32)
    params = init_params(kp, kernel_size=2, nb_q_conv_layer=0, out_channels=2)

    out = classical_backbone_forward(x, params)
    out = jax.block_until_ready(out)

    ref = _ref_forward(x, params)
    assert out.shape == (2, 2, 4, 4), f"unexpected output shape {out.shape}"
    assert jnp.allclose(out, ref, atol=1e-4, rtol=1e-4), "mismatch vs JAX reference"

    print("KERNEL_OK")
</pallas_src>

<mosaic_0001>
module attributes {stable_mosaic.version = 11 : i64} {
  func.func @kernel(%arg0: i32, %arg1: i32, %arg2: memref<1x1x10x1xf32, #tpu.memory_space<vmem>>, %arg3: memref<1x1x10x1xf32, #tpu.memory_space<vmem>>, %arg4: memref<1x1x10x1xf32, #tpu.memory_space<vmem>>, %arg5: memref<1x1x9x1xf32, #tpu.memory_space<vmem>>, %arg6: memref<1x1x9x1xf32, #tpu.memory_space<vmem>>, %arg7: memref<1x1x9x1xf32, #tpu.memory_space<vmem>>, %arg8: memref<4x32xf32, #tpu.memory_space<vmem>>, %arg9: memref<1x32xf32, #tpu.memory_space<vmem>>, %arg10: memref<1x1x9x32xf32, #tpu.memory_space<vmem>>) attributes {dimension_semantics = [#tpu.dimension_semantics<parallel>, #tpu.dimension_semantics<parallel>], iteration_bounds = array<i64: 2, 9>, scalar_prefetch = 0 : i64, scratch_operands = 0 : i64, tpu.core_type = #tpu.core_type<tc>, window_params = [{transform_indices = @transform_0, window_bounds = array<i64: 1, 1, 10, 1>}, {transform_indices = @transform_1, window_bounds = array<i64: 1, 1, 10, 1>}, {transform_indices = @transform_2, window_bounds = array<i64: 1, 1, 10, 1>}, {transform_indices = @transform_3, window_bounds = array<i64: 1, 1, 9, 1>}, {transform_indices = @transform_4, window_bounds = array<i64: 1, 1, 9, 1>}, {transform_indices = @transform_5, window_bounds = array<i64: 1, 1, 9, 1>}, {pipeline_mode = #tpu.pipeline_mode<synchronous>, transform_indices = @transform_6, window_bounds = array<i64: 4, 32>}, {pipeline_mode = #tpu.pipeline_mode<synchronous>, transform_indices = @transform_7, window_bounds = array<i64: 1, 32>}, {transform_indices = @transform_8, window_bounds = array<i64: 1, 1, 9, 32>}]} {
    %c0 = arith.constant 0 : index
    %c0_0 = arith.constant 0 : index
    %c0_1 = arith.constant 0 : index
    %c0_2 = arith.constant 0 : index
    %0 = vector.load %arg2[%c0, %c0_0, %c0_1, %c0_2] : memref<1x1x10x1xf32, #tpu.memory_space<vmem>>, vector<1x1x10x1xf32>
    %1 = vector.shape_cast %0 : vector<1x1x10x1xf32> to vector<10x1xf32>
    %c0_3 = arith.constant 0 : index
    %c0_4 = arith.constant 0 : index
    %c0_5 = arith.constant 0 : index
    %c0_6 = arith.constant 0 : index
    %2 = vector.load %arg3[%c0_3, %c0_4, %c0_5, %c0_6] : memref<1x1x10x1xf32, #tpu.memory_space<vmem>>, vector<1x1x10x1xf32>
    %3 = vector.shape_cast %2 : vector<1x1x10x1xf32> to vector<10x1xf32>
    %c0_7 = arith.constant 0 : index
    %c0_8 = arith.constant 0 : index
    %c0_9 = arith.constant 0 : index
    %c0_10 = arith.constant 0 : index
    %4 = vector.load %arg4[%c0_7, %c0_8, %c0_9, %c0_10] : memref<1x1x10x1xf32, #tpu.memory_space<vmem>>, vector<1x1x10x1xf32>
    %5 = vector.shape_cast %4 : vector<1x1x10x1xf32> to vector<10x1xf32>
    %c0_11 = arith.constant 0 : index
    %c0_12 = arith.constant 0 : index
    %c0_13 = arith.constant 0 : index
    %c0_14 = arith.constant 0 : index
    %6 = vector.load %arg5[%c0_11, %c0_12, %c0_13, %c0_14] : memref<1x1x9x1xf32, #tpu.memory_space<vmem>>, vector<1x1x9x1xf32>
    %7 = vector.shape_cast %6 : vector<1x1x9x1xf32> to vector<9x1xf32>
    %c0_15 = arith.constant 0 : index
    %c0_16 = arith.constant 0 : index
    %c0_17 = arith.constant 0 : index
    %c0_18 = arith.constant 0 : index
    %8 = vector.load %arg6[%c0_15, %c0_16, %c0_17, %c0_18] : memref<1x1x9x1xf32, #tpu.memory_space<vmem>>, vector<1x1x9x1xf32>
    %9 = vector.shape_cast %8 : vector<1x1x9x1xf32> to vector<9x1xf32>
    %c0_19 = arith.constant 0 : index
    %c0_20 = arith.constant 0 : index
    %c0_21 = arith.constant 0 : index
    %c0_22 = arith.constant 0 : index
    %10 = vector.load %arg7[%c0_19, %c0_20, %c0_21, %c0_22] : memref<1x1x9x1xf32, #tpu.memory_space<vmem>>, vector<1x1x9x1xf32>
    %11 = vector.shape_cast %10 : vector<1x1x9x1xf32> to vector<9x1xf32>
    %12 = vector.extract_strided_slice %1 {offsets = [0, 0], sizes = [9, 1], strides = [1, 1]} : vector<10x1xf32> to vector<9x1xf32>
    %13 = vector.extract_strided_slice %3 {offsets = [0, 0], sizes = [9, 1], strides = [1, 1]} : vector<10x1xf32> to vector<9x1xf32>
    %14 = tpu.concatenate %12, %7, %13, %9 in 1 : vector<9x1xf32>, vector<9x1xf32>, vector<9x1xf32>, vector<9x1xf32> -> vector<9x4xf32>
    %15 = vector.extract_strided_slice %1 {offsets = [1, 0], sizes = [9, 1], strides = [1, 1]} : vector<10x1xf32> to vector<9x1xf32>
    %16 = vector.extract_strided_slice %3 {offsets = [1, 0], sizes = [9, 1], strides = [1, 1]} : vector<10x1xf32> to vector<9x1xf32>
    %17 = tpu.concatenate %7, %15, %9, %16 in 1 : vector<9x1xf32>, vector<9x1xf32>, vector<9x1xf32>, vector<9x1xf32> -> vector<9x4xf32>
    %18 = vector.extract_strided_slice %3 {offsets = [0, 0], sizes = [9, 1], strides = [1, 1]} : vector<10x1xf32> to vector<9x1xf32>
    %19 = vector.extract_strided_slice %5 {offsets = [0, 0], sizes = [9, 1], strides = [1, 1]} : vector<10x1xf32> to vector<9x1xf32>
    %20 = tpu.concatenate %18, %9, %19, %11 in 1 : vector<9x1xf32>, vector<9x1xf32>, vector<9x1xf32>, vector<9x1xf32> -> vector<9x4xf32>
    %21 = vector.extract_strided_slice %3 {offsets = [1, 0], sizes = [9, 1], strides = [1, 1]} : vector<10x1xf32> to vector<9x1xf32>
    %22 = vector.extract_strided_slice %5 {offsets = [1, 0], sizes = [9, 1], strides = [1, 1]} : vector<10x1xf32> to vector<9x1xf32>
    %23 = tpu.concatenate %9, %21, %11, %22 in 1 : vector<9x1xf32>, vector<9x1xf32>, vector<9x1xf32>, vector<9x1xf32> -> vector<9x4xf32>
    %24 = tpu.concatenate %14, %17, %20, %23 in 0 : vector<9x4xf32>, vector<9x4xf32>, vector<9x4xf32>, vector<9x4xf32> -> vector<36x4xf32>
    %c0_23 = arith.constant 0 : index
    %c0_24 = arith.constant 0 : index
    %25 = vector.load %arg8[%c0_23, %c0_24] : memref<4x32xf32, #tpu.memory_space<vmem>>, vector<4x32xf32>
    %cst = arith.constant 0.000000e+00 : f32
    %26 = vector.broadcast %cst : f32 to vector<36x32xf32>
    %27 = vector.extract_strided_slice %24 {offsets = [0, 0], sizes = [36, 1], strides = [1, 1]} : vector<36x4xf32> to vector<36x1xf32>
    %28 = vector.extract_strided_slice %25 {offsets = [0, 0], sizes = [1, 32], strides = [1, 1]} : vector<4x32xf32> to vector<1x32xf32>
    %29 = vector.broadcast %27 : vector<36x1xf32> to vector<36x32xf32>
    %30 = vector.broadcast %28 : vector<1x32xf32> to vector<36x32xf32>
    %31 = arith.mulf %29, %30 : vector<36x32xf32>
    %32 = arith.addf %26, %31 : vector<36x32xf32>
    %33 = vector.extract_strided_slice %24 {offsets = [0, 1], sizes = [36, 1], strides = [1, 1]} : vector<36x4xf32> to vector<36x1xf32>
    %34 = vector.extract_strided_slice %25 {offsets = [1, 0], sizes = [1, 32], strides = [1, 1]} : vector<4x32xf32> to vector<1x32xf32>
    %35 = vector.broadcast %33 : vector<36x1xf32> to vector<36x32xf32>
    %36 = vector.broadcast %34 : vector<1x32xf32> to vector<36x32xf32>
    %37 = arith.mulf %35, %36 : vector<36x32xf32>
    %38 = arith.addf %32, %37 : vector<36x32xf32>
    %39 = vector.extract_strided_slice %24 {offsets = [0, 2], sizes = [36, 1], strides = [1, 1]} : vector<36x4xf32> to vector<36x1xf32>
    %40 = vector.extract_strided_slice %25 {offsets = [2, 0], sizes = [1, 32], strides = [1, 1]} : vector<4x32xf32> to vector<1x32xf32>
    %41 = vector.broadcast %39 : vector<36x1xf32> to vector<36x32xf32>
    %42 = vector.broadcast %40 : vector<1x32xf32> to vector<36x32xf32>
    %43 = arith.mulf %41, %42 : vector<36x32xf32>
    %44 = arith.addf %38, %43 : vector<36x32xf32>
    %45 = vector.extract_strided_slice %24 {offsets = [0, 3], sizes = [36, 1], strides = [1, 1]} : vector<36x4xf32> to vector<36x1xf32>
    %46 = vector.extract_strided_slice %25 {offsets = [3, 0], sizes = [1, 32], strides = [1, 1]} : vector<4x32xf32> to vector<1x32xf32>
    %47 = vector.broadcast %45 : vector<36x1xf32> to vector<36x32xf32>
    %48 = vector.broadcast %46 : vector<1x32xf32> to vector<36x32xf32>
    %49 = arith.mulf %47, %48 : vector<36x32xf32>
    %50 = arith.addf %44, %49 : vector<36x32xf32>
    %c0_25 = arith.constant 0 : index
    %c0_26 = arith.constant 0 : index
    %51 = vector.load %arg9[%c0_25, %c0_26] : memref<1x32xf32, #tpu.memory_space<vmem>>, vector<1x32xf32>
    %52 = vector.broadcast %51 : vector<1x32xf32> to vector<36x32xf32>
    %53 = arith.addf %50, %52 : vector<36x32xf32>
    %cst_27 = arith.constant 0.000000e+00 : f32
    %54 = vector.broadcast %cst_27 : f32 to vector<36x32xf32>
    %55 = arith.maximumf %53, %54 : vector<36x32xf32>
    %56 = vector.extract_strided_slice %55 {offsets = [0, 0], sizes = [9, 32], strides = [1, 1]} : vector<36x32xf32> to vector<9x32xf32>
    %57 = vector.extract_strided_slice %55 {offsets = [9, 0], sizes = [9, 32], strides = [1, 1]} : vector<36x32xf32> to vector<9x32xf32>
    %58 = arith.maximumf %56, %57 : vector<9x32xf32>
    %59 = vector.extract_strided_slice %55 {offsets = [18, 0], sizes = [9, 32], strides = [1, 1]} : vector<36x32xf32> to vector<9x32xf32>
    %60 = vector.extract_strided_slice %55 {offsets = [27, 0], sizes = [9, 32], strides = [1, 1]} : vector<36x32xf32> to vector<9x32xf32>
    %61 = arith.maximumf %59, %60 : vector<9x32xf32>
    %62 = arith.maximumf %58, %61 : vector<9x32xf32>
    %c0_28 = arith.constant 0 : index
    %c0_29 = arith.constant 0 : index
    %c0_30 = arith.constant 0 : index
    %c0_31 = arith.constant 0 : index
    %63 = vector.load %arg10[%c0_28, %c0_29, %c0_30, %c0_31] : memref<1x1x9x32xf32, #tpu.memory_space<vmem>>, vector<1x1x9x32xf32>
    %64 = vector.shape_cast %63 : vector<1x1x9x32xf32> to vector<9x32xf32>
    %65 = vector.shape_cast %62 : vector<9x32xf32> to vector<1x1x9x32xf32>
    tpu.vector_store %arg10[%c0_28, %c0_29, %c0_30, %c0_31], %65 {strides = array<i32>} : memref<1x1x9x32xf32, #tpu.memory_space<vmem>>, vector<1x1x9x32xf32>,
    return
  }
  func.func @transform_0(%arg0: i32, %arg1: i32) -> (i32, i32, i32, i32) {
    %c2_i32 = arith.constant 2 : i32
    %0 = arith.muli %c2_i32, %arg1 : i32
    %c0_i32 = arith.constant 0 : i32
    %1 = arith.addi %0, %c0_i32 : i32
    %c0_i32_0 = arith.constant 0 : i32
    %c0_i32_1 = arith.constant 0 : i32
    %c0_i32_2 = arith.constant 0 : i32
    return %arg0, %1, %c0_i32_0, %c0_i32_1 : i32, i32, i32, i32
  }
  func.func @transform_1(%arg0: i32, %arg1: i32) -> (i32, i32, i32, i32) {
    %c2_i32 = arith.constant 2 : i32
    %0 = arith.muli %c2_i32, %arg1 : i32
    %c1_i32 = arith.constant 1 : i32
    %1 = arith.addi %0, %c1_i32 : i32
    %c0_i32 = arith.constant 0 : i32
    %c0_i32_0 = arith.constant 0 : i32
    %c0_i32_1 = arith.constant 0 : i32
    return %arg0, %1, %c0_i32, %c0_i32_0 : i32, i32, i32, i32
  }
  func.func @transform_2(%arg0: i32, %arg1: i32) -> (i32, i32, i32, i32) {
    %c2_i32 = arith.constant 2 : i32
    %0 = arith.muli %c2_i32, %arg1 : i32
    %c2_i32_0 = arith.constant 2 : i32
    %1 = arith.addi %0, %c2_i32_0 : i32
    %c0_i32 = arith.constant 0 : i32
    %c0_i32_1 = arith.constant 0 : i32
    %c0_i32_2 = arith.constant 0 : i32
    return %arg0, %1, %c0_i32, %c0_i32_1 : i32, i32, i32, i32
  }
  func.func @transform_3(%arg0: i32, %arg1: i32) -> (i32, i32, i32, i32) {
    %c2_i32 = arith.constant 2 : i32
    %0 = arith.muli %c2_i32, %arg1 : i32
    %c0_i32 = arith.constant 0 : i32
    %1 = arith.addi %0, %c0_i32 : i32
    %c0_i32_0 = arith.constant 0 : i32
    %c0_i32_1 = arith.constant 0 : i32
    %c0_i32_2 = arith.constant 0 : i32
    return %arg0, %1, %c0_i32_0, %c0_i32_1 : i32, i32, i32, i32
  }
  func.func @transform_4(%arg0: i32, %arg1: i32) -> (i32, i32, i32, i32) {
    %c2_i32 = arith.constant 2 : i32
    %0 = arith.muli %c2_i32, %arg1 : i32
    %c1_i32 = arith.constant 1 : i32
    %1 = arith.addi %0, %c1_i32 : i32
    %c0_i32 = arith.constant 0 : i32
    %c0_i32_0 = arith.constant 0 : i32
    %c0_i32_1 = arith.constant 0 : i32
    return %arg0, %1, %c0_i32, %c0_i32_0 : i32, i32, i32, i32
  }
  func.func @transform_5(%arg0: i32, %arg1: i32) -> (i32, i32, i32, i32) {
    %c2_i32 = arith.constant 2 : i32
    %0 = arith.muli %c2_i32, %arg1 : i32
    %c2_i32_0 = arith.constant 2 : i32
    %1 = arith.addi %0, %c2_i32_0 : i32
    %c0_i32 = arith.constant 0 : i32
    %c0_i32_1 = arith.constant 0 : i32
    %c0_i32_2 = arith.constant 0 : i32
    return %arg0, %1, %c0_i32, %c0_i32_1 : i32, i32, i32, i32
  }
  func.func @transform_6(%arg0: i32, %arg1: i32) -> (i32, i32) {
    %c0_i32 = arith.constant 0 : i32
    %c0_i32_0 = arith.constant 0 : i32
    %c0_i32_1 = arith.constant 0 : i32
    return %c0_i32, %c0_i32_0 : i32, i32
  }
  func.func @transform_7(%arg0: i32, %arg1: i32) -> (i32, i32) {
    %c0_i32 = arith.constant 0 : i32
    %c0_i32_0 = arith.constant 0 : i32
    %c0_i32_1 = arith.constant 0 : i32
    return %c0_i32, %c0_i32_0 : i32, i32
  }
  func.func @transform_8(%arg0: i32, %arg1: i32) -> (i32, i32, i32, i32) {
    %c0_i32 = arith.constant 0 : i32
    %c0_i32_0 = arith.constant 0 : i32
    %c0_i32_1 = arith.constant 0 : i32
    return %arg0, %arg1, %c0_i32, %c0_i32_0 : i32, i32, i32, i32
  }
}

</mosaic_0001>

<bundles_post_ra>
// kernel: tpu_custom_call.1
= control target key start
LH: loop header
LB: loop body
LE: loop exit
PB: predicated region body
PF: predicated region fallthrough
CT: control target
= control target key end

     0   :  { %s1313_s27 = smov 0   ;;  %s1315_s28 = smov 0   ;;  %s1520_s0 = inlined_call_operand.vmem [shape: f32[2,20,10,1], index: 0, kind: input, shape index: {}]   ;;  %s1521_s1 = inlined_call_operand.vmem [shape: f32[2,20,10,1], index: 1, kind: input, shape index: {}]   ;;  %s1522_s2 = inlined_call_operand.vmem [shape: f32[2,20,10,1], index: 2, kind: input, shape index: {}]   ;;  %s1523_s3 = inlined_call_operand.vmem [shape: f32[2,20,9,1], index: 3, kind: input, shape index: {}]   ;;  %s1524_s4 = inlined_call_operand.vmem [shape: f32[2,20,9,1], index: 4, kind: input, shape index: {}]   ;;  %s1525_s5 = inlined_call_operand.vmem [shape: f32[2,20,9,1], index: 5, kind: input, shape index: {}]   ;;  %s1526_s6 = inlined_call_operand.vmem [shape: f32[4,32], index: 6, kind: input, shape index: {}]   ;;  %s1527_s7 = inlined_call_operand.vmem [shape: f32[1,32], index: 7, kind: input, shape index: {}]   ;;  %s1528_s8 = inlined_call_operand.vmem [shape: f32[2,9,9,32], index: 8, kind: output, shape index: {}]  }
   0x1   :  { %1529 = sst [smem:[#allocation4_spill]] %s1523_s3  ;;  %s1317_s29 = smov 0  }
   0x2   :  { %s1319_s30 = smov 0   ;;  %s1321_s9 = smov 0  }
   0x3 LB: > { %s27_s10 = sadd.s32 1, %s1251_s29  ;;  %s30_s11 = sadd.s32 1, %s1255_s30  ;;  %s1259_s9 = sphi %s1321_s9, %s18_s9   ;;  %s1255_s30 = sphi %s1319_s30, %s1538_s30   ;;  %s1251_s29 = sphi %s1317_s29, %s1537_s29   ;;  %s1247_s28 = sphi %s1315_s28, %s1536_s28   ;;  %s1243_s27 = sphi %s1313_s27, %s1535_s27  }
   0x4   : > { %p28_p0 = scmp.ge.s32.totalorder %s27_s10, 9  ;;  %p1132_p1 = scmp.ge.s32.totalorder %s1259_s9, 1 }
   0x5   : > { %p402_p2 = scmp.lt.s32.totalorder %s1259_s9, 19 }
   0x6   : > { %s1540_s10 = smov (%p28_p0, %s27_s10), 0  ;;  %s1542_s11 = smov (!%p28_p0, %s30_s11), %s1255_s30 }
   0x7   : > { %1530 = sst [smem:[#allocation2_spill]] %s1540_s10  ;;  %p403_p3 = pnand %p1132_p1, %p402_p2 }
   0x8   : > { %p32_p4 = scmp.ge.s32.totalorder %s1542_s11, 2  ;;  %s1346_s12 = sshll.u32 (!%p403_p3), %s1243_s27, 1 }
   0x9   : > { %406 = sbr.rel (%p403_p3) target bundleno = 372 (0x174), region = 52  ;;  %p500_p5 = scmp.lt.s32.totalorder (!%p403_p3), %s1247_s28, 1 }
   0xa   : > { %s1544_s11 = smov (%p32_p4, %s1542_s11), 0  ;;  %p502_p6 = scmp.lt.s32.totalorder (!%p403_p3), %s1346_s12, 19 }
   0xb   : > { %1531 = sst [smem:[#allocation3_spill]] %s1544_s11  ;;  %s511_s17 = sadd.s32 (!%p403_p3), 1, %s1346_s12 }
   0xc   : > { %p514_p7 = scmp.lt.s32.totalorder (!%p403_p3), %s511_s17, 19  ;;  %s1532_s3 = sld [smem:[#allocation4_spill]] (!%p403_p3) }
   0xd   : > { %s1261_s22 = smov (!%p403_p3), 1   ;;  %s1263_s11 = smov (!%p403_p3), 3  }
   0xe   : > { %s1546_s28 = smov (!%p500_p5, %s1247_s28), 1  ;;  %s1548_s17 = smov (!%p514_p7, %s511_s17), 19  ;;  %vm629_vm0 = vcmask 1046528   ;;  %v1264_v21 = vmov 0   ;;  %vm618_vm1 = vcmask 7168   ;;  %vm621_vm2 = vcmask 15360  }
   0xf   : > { %s503_s13 = scalar_select %p502_p6, %s1346_s12, 19  ;;  %1204 = vset.pattern.permute.xlu0 %v1264_v21  ;;  %1207 = vset.pattern.permute.xlu1 %v1264_v21  ;;  %vm624_vm3 = vcmask 23552   ;;  %v1265_v34 = vmov 1   ;;  %v1266_v38 = vmov 2   ;;  %vm717_vm4 = vcmask 1040384  }
  0x10   : > { %s1353_s14 = smul.u32 40, %s1546_s28  ;;  %s1137_s23 = sshll.u32 %s1548_s17, 1  ;;  %1209 = vset.pattern.permute.xlu2 %v1264_v21  ;;  %v1267_v56 = vmov 3   ;;  %vm725_vm5 = vcmask 1041408   ;;  %vm733_vm6 = vcmask 1042432   ;;  %vm914_vm7 = vcmask 253952  }
  0x11   : > { %s1134_s15 = sshll.u32 %s503_s13, 1  ;;  %s1262_s17 = smov 2   ;;  %vm904_vm8 = vcmask 1045504   ;;  %vm912_vm9 = vcmask 261120  }
  0x12   : > { %s506_s16 = sadd.s32 %s1353_s14, %s1134_s15  ;;  %s518_s13 = sadd.s32 %s1353_s14, %s1137_s23 }
  0x13   : > { %s1135_s18 = sshll.u32 %s506_s16, 3  ;;  %s1138_s15 = sshll.u32 %s518_s13, 3 }
  0x14   : > { %s545_s21 = scalar_lea.vmem %s1532_s3, %s1135_s18  ;;  %s508_s26 = scalar_lea.vmem %s1520_s0, %s1135_s18 }
  0x15   : > { %v1360_v0 = vld [vmem:[%s545_s21] sm:$0xff]  ;;  %s520_s10 = scalar_lea.vmem %s1521_s1, %s1138_s15  ;;  %v1371_v1 = vld [vmem:[%s545_s21 + $0x8] sm:$0x1]  ;;  %s557_s3 = scalar_lea.vmem %s1524_s4, %s1138_s15 }
  0x16   : > { %596 = vrot.lane.b32.xlu0 %v1360_v0, %s1261_s22  ;;  %v582_v2 = vld [vmem:[%s508_s26] sm:$0xff]  ;;  %v1376_v3 = vld [vmem:[%s508_s26 + $0x8] sm:$0x3]  ;;  %s524_s18 = sadd.s32 2, %s1346_s12  ;;  %p575_p9 = scmp.lt.s32.totalorder %s1243_s27, 8 }
  0x17   : > { %v1378_v4 = vld [vmem:[%s520_s10] sm:$0xff]  ;;  %v630_v6 = vrot.slane %v582_v2, 1  ;;  %v631_v7 = vrot.slane %v1376_v3, 1  ;;  %v1389_v8 = vld [vmem:[%s520_s10 + $0x8] sm:$0x3]  ;;  %p527_p8 = scmp.lt.s32.totalorder %s524_s18, 19 }
  0x18   : > { %604 = vrot.lane.b32.xlu1 %v1378_v4, %s1262_s17  ;;  %v1382_v5 = vld [vmem:[%s557_s3] sm:$0xff]  ;;  %v1395_v10 = vld [vmem:[%s557_s3 + $0x8] sm:$0x1]  ;;  %v645_v11 = vrot.slane %v1378_v4, 1  ;;  %v646_v12 = vrot.slane %v1389_v8, 1  ;;  %s1552_s27 = smov (!%p575_p9, %s1243_s27), 8 }
  0x19   : > { %612 = vrot.lane.b32.xlu2 %v1382_v5, %s1263_s11  ;;  %v632_v9 = vsel %vm629_vm0, %v630_v6, %v631_v7  ;;  %s1550_s18 = smov (!%p527_p8, %s524_s18), 19  ;;  %s1156_s19 = smul.u32 18, %s1546_s28 }
  0x1a   : > { %s1140_s3 = sshll.u32 %s1550_s18, 1  ;;  %v647_v13 = vsel %vm629_vm0, %v645_v11, %v646_v12  ;;  %s1151_s20 = sshll.u32 %s1552_s27, 1 }
  0x1b   : > { %s531_s10 = sadd.s32 %s1353_s14, %s1140_s3 }
  0x1c   : > { %s1141_s12 = sshll.u32 %s531_s10, 3 }
  0x1d   : > { %s533_s24 = scalar_lea.vmem %s1522_s2, %s1141_s12  ;;  %s570_s26 = scalar_lea.vmem %s1525_s5, %s1141_s12 }
  0x1e   : > { %598 = vrot.lane.b32.xlu0 %v1371_v1, %s1261_s22  ;;  %v587_v14 = vld [vmem:[%s533_s24 + $0x8] sm:$0x3]  ;;  %v586_v15 = vld [vmem:[%s533_s24] sm:$0xff] }
  0x1f   : > { %v592_v16 = vld [vmem:[%s570_s26] sm:$0xff]  ;;  %v593_v17 = vld [vmem:[%s570_s26 + $0x8] sm:$0x1]  ;;  %v701_v18 = vrot.slane %v587_v14, 1  ;;  %v700_v19 = vrot.slane %v586_v15, 1 }
  0x20   : > { %606 = vrot.lane.b32.xlu1 %v1389_v8, %s1262_s17 }
  0x21   : > { %614 = vrot.lane.b32.xlu2 %v1395_v10, %s1263_s11  ;;  %v702_v20 = vsel %vm629_vm0, %v700_v19, %v701_v18 }
  0x26   : > { %633 = vrot.lane.b32.xlu0 %v632_v9, %s1261_s22 }
  0x28   : > { %635 = vrot.lane.b32.xlu1 %v631_v7, %s1261_s22 }
  0x29   : > { %639 = vrot.lane.b32.xlu2 %v1382_v5, %s1262_s17 }
  0x2e   : > { %641 = vrot.lane.b32.xlu0 %v1395_v10, %s1262_s17 }
  0x30   : > { %648 = vrot.lane.b32.xlu1 %v647_v13, %s1263_s11 }
  0x31   : > { %650 = vrot.lane.b32.xlu2 %v646_v12, %s1263_s11 }
  0x36   : > { %660 = vrot.lane.b32.xlu0 %v1382_v5, %s1261_s22 }
  0x38   : > { %662 = vrot.lane.b32.xlu1 %v1395_v10, %s1261_s22 }
  0x39   : > { %668 = vrot.lane.b32.xlu2 %v586_v15, %s1262_s17 }
  0x3e   : > { %670 = vrot.lane.b32.xlu0 %v587_v14, %s1262_s17 }
  0x40   : > { %676 = vrot.lane.b32.xlu1 %v592_v16, %s1263_s11 }
  0x41   : > { %678 = vrot.lane.b32.xlu2 %v593_v17, %s1263_s11 }
  0x46   : > { %688 = vrot.lane.b32.xlu0 %v647_v13, %s1261_s22 }
  0x48   : > { %690 = vrot.lane.b32.xlu1 %v646_v12, %s1261_s22 }
  0x49   : > { %694 = vrot.lane.b32.xlu2 %v592_v16, %s1262_s17 }
  0x4e   : > { %696 = vrot.lane.b32.xlu0 %v593_v17, %s1262_s17  ;;  %s579_s17 = sadd.s32 %s1156_s19, %s1151_s20 }
  0x50   : > { %703 = vrot.lane.b32.xlu1 %v702_v20, %s1263_s11 }
  0x51   : > { %705 = vrot.lane.b32.xlu2 %v701_v18, %s1263_s11  ;;  %s1152_s11 = sshll.u32 %s579_s17, 3 }
  0x52   : > { %s581_s18 = scalar_lea.vmem %s1528_s8, %s1152_s11 }
  0x73   : > { %v613_v22 = vpop.permute.xlu2 %612 }
  0x7b   : > { %v615_v23 = vpop.permute.xlu2 %614 }
  0x83   : > { %v640_v27 = vpop.permute.xlu2 %639 }
  0x88   : > { %v597_v24 = vpop.permute.xlu0 %596 }
  0x89   : > { %v619_v25 = vsel %vm618_vm1, %v582_v2, %v597_v24 }
  0x8a   : > { %v605_v26 = vpop.permute.xlu1 %604 }
  0x8b   : > { %v622_v28 = vsel %vm621_vm2, %v619_v25, %v605_v26  ;;  %v651_v33 = vpop.permute.xlu2 %650 }
  0x8c   : > { %v1438_v30 = vsel %vm624_vm3, %v622_v28, %v613_v22 }
  0x8d   : > { %744 = vperm.xlu0 %1204, %v1438_v30  }
  0x90   : > { %v599_v29 = vpop.permute.xlu0 %598 }
  0x91   : > { %v620_v40 = vsel %vm618_vm1, %v1376_v3, %v599_v29 }
  0x92   : > { %v607_v31 = vpop.permute.xlu1 %606 }
  0x93   : > { %v669_v39 = vpop.permute.xlu2 %668  ;;  %v623_v42 = vsel %vm621_vm2, %v620_v40, %v607_v31 }
  0x94   : > { %v626_v47 = vsel %vm624_vm3, %v623_v42, %v615_v23 }
  0x95   : > { %1205 = vset.pattern.permute.xlu0 %v1265_v34 }
  0x96   : > { %778 = vperm.xlu0 %1205, %v1438_v30  }
  0x98   : > { %v634_v32 = vpop.permute.xlu0 %633 }
  0x99   : > { %v654_v37 = vsel %vm618_vm1, %v1360_v0, %v634_v32 }
  0x9a   : > { %v636_v35 = vpop.permute.xlu1 %635  ;;  %v656_v41 = vsel %vm621_vm2, %v654_v37, %v640_v27 }
  0x9b   : > { %v679_v49 = vpop.permute.xlu2 %678  ;;  %v655_v50 = vsel %vm618_vm1, %v1371_v1, %v636_v35  ;;  %v741_v35 = vld [vmem:[%s1526_s6] sm:$0xf] }
  0x9c   : > { %v766_v37 = vperm.slane %v741_v35, 0 }
  0x9e   : > { %1206 = vset.pattern.permute.xlu0 %v1266_v38 }
  0x9f   : > { %809 = vperm.xlu0 %1206, %v1438_v30  }
  0xa0   : > { %v642_v36 = vpop.permute.xlu0 %641 }
  0xa1   : > { %v657_v52 = vsel %vm621_vm2, %v655_v50, %v642_v36  ;;  %v797_v36 = vperm.slane %v741_v35, 1 }
  0xa2   : > { %v649_v43 = vpop.permute.xlu1 %648  ;;  %v659_v55 = vsel %vm624_vm3, %v657_v52, %v651_v33 }
  0xa3   : > { %v658_v44 = vsel %vm624_vm3, %v656_v41, %v649_v43  ;;  %v719_v58 = vrot.slane %v659_v55, 7  ;;  %v695_v60 = vpop.permute.xlu2 %694 }
  0xa4   : > { %v718_v46 = vrot.slane %v658_v44, 7  ;;  %v859_v44 = vperm.slane %v741_v35, 3 }
  0xa6   : > { %v1454_v48 = vsel %vm717_vm4, %v626_v47, %v718_v46  ;;  %v720_v0 = vsel %vm717_vm4, %v718_v46, %v719_v58 }
  0xa7   : > { %749 = vperm.xlu1 %1207, %v1454_v48   ;;  %813 = vperm.xlu0 %1206, %v1454_v48  }
  0xa8   : > { %v661_v45 = vpop.permute.xlu0 %660 }
  0xa9   : > { %v682_v54 = vsel %vm618_vm1, %v1378_v4, %v661_v45 }
  0xaa   : > { %v663_v51 = vpop.permute.xlu1 %662  ;;  %v684_v57 = vsel %vm621_vm2, %v682_v54, %v669_v39 }
  0xab   : > { %v683_v2 = vsel %vm618_vm1, %v1389_v8, %v663_v51  ;;  %v706_v11 = vpop.permute.xlu2 %705 }
  0xaf   : > { %1208 = vset.pattern.permute.xlu1 %v1265_v34  ;;  %1218 = vset.pattern.permute.xlu0 %v1267_v56 }
  0xb0   : > { %v671_v53 = vpop.permute.xlu0 %670  ;;  %782 = vperm.xlu1 %1208, %v1454_v48  }
  0xb1   : > { %v685_v4 = vsel %vm621_vm2, %v683_v2, %v671_v53 }
  0xb2   : > { %v677_v59 = vpop.permute.xlu1 %676  ;;  %v687_v13 = vsel %vm624_vm3, %v685_v4, %v679_v49 }
  0xb3   : > { %v686_v61 = vsel %vm624_vm3, %v684_v57, %v677_v59  ;;  %v727_v8 = vrot.slane %v687_v13, 6  ;;  %v1220_v57 = vld [vmem:[%s1527_s7] ss:$0 sm:$0xff] }
  0xb4   : > { %v726_v63 = vrot.slane %v686_v61, 6 }
  0xb6   : > { %v739_v1 = vsel %vm725_vm5, %v720_v0, %v726_v63  ;;  %v728_v19 = vsel %vm725_vm5, %v726_v63, %v727_v8 }
  0xb7   : > { %754 = vperm.xlu2 %1209, %v739_v1   ;;  %848 = vperm.xlu0 %1218, %v739_v1  }
  0xb8   : > { %v689_v62 = vpop.permute.xlu0 %688  ;;  %1210 = vset.pattern.permute.xlu1 %v1264_v21 }
  0xb9   : > { %v709_v12 = vsel %vm618_vm1, %v1382_v5, %v689_v62 }
  0xba   : > { %v691_v3 = vpop.permute.xlu1 %690  ;;  %v711_v15 = vsel %vm621_vm2, %v709_v12, %v695_v60 }
  0xbb   : > { %v710_v6 = vsel %vm618_vm1, %v1395_v10, %v691_v3 }
  0xc0   : > { %v697_v7 = vpop.permute.xlu0 %696 }
  0xc1   : > { %v712_v9 = vsel %vm621_vm2, %v710_v6, %v697_v7 }
  0xc2   : > { %v714_v14 = vsel %vm624_vm3, %v712_v9, %v706_v11  ;;  %v704_v17 = vpop.permute.xlu1 %703 }
  0xc3   : > { %v735_v16 = vrot.slane %v714_v14, 5  ;;  %v713_v18 = vsel %vm624_vm3, %v711_v15, %v704_v17 }
  0xc4   : > { %v734_v10 = vrot.slane %v713_v18, 5 }
  0xc6   : > { %v740_v20 = vsel %vm733_vm6, %v728_v19, %v734_v10  ;;  %v736_v21 = vsel %vm733_vm6, %v734_v10, %v735_v16 }
  0xc7   : > { %759 = vperm.xlu1 %1210, %v740_v20   ;;  %763 = vperm.xlu2 %1209, %v736_v21  }
  0xcf   : > { %1212 = vset.pattern.permute.xlu1 %v1265_v34  ;;  %1211 = vset.pattern.permute.xlu2 %v1265_v34 }
  0xd0   : > { %790 = vperm.xlu1 %1212, %v740_v20   ;;  %786 = vperm.xlu2 %1211, %v739_v1  }
  0xd8   : > { %1213 = vset.pattern.permute.xlu1 %v1266_v38  ;;  %794 = vperm.xlu2 %1211, %v736_v21  }
  0xd9   : > { %821 = vperm.xlu1 %1213, %v740_v20  }
  0xe0   : > { %1214 = vset.pattern.permute.xlu2 %v1266_v38 }
  0xe1   : > { %1215 = vset.pattern.permute.xlu1 %v1267_v56  ;;  %825 = vperm.xlu2 %1214, %v736_v21  }
  0xe2   : > { %852 = vperm.xlu1 %1215, %v740_v20  }
  0xe9   : > { %1216 = vset.pattern.permute.xlu2 %v1267_v56 }
  0xea   : > { %1217 = vset.pattern.permute.xlu1 %v1266_v38  ;;  %856 = vperm.xlu2 %1216, %v736_v21  }
  0xeb   : > { %817 = vperm.xlu1 %1217, %v739_v1  }
  0xf2   : > { %844 = vperm.xlu2 %1216, %v1454_v48  }
  0xf3   : > { %1219 = vset.pattern.permute.xlu1 %v1267_v56 }
  0xf4   : > { %840 = vperm.xlu1 %1219, %v1438_v30   ;;  %v828_v30 = vperm.slane %v741_v35, 2 }
  0xff   : > { %v745_v26 = vpop.permute.xlu0 %744 }
 0x100   : > { %v767_v17 = vmul.f32 %v766_v37, %v745_v26 }
 0x108   : > { %v779_v29 = vpop.permute.xlu0 %778 }
 0x109   : > { %v798_v8 = vmul.f32 %v797_v36, %v779_v29 }
 0x111   : > { %v755_v5 = vpop.permute.xlu2 %754  ;;  %v810_v33 = vpop.permute.xlu0 %809 }
 0x112   : > { %v769_v63 = vmul.f32 %v766_v37, %v755_v5  ;;  %v829_v18 = vmul.f32 %v828_v30, %v810_v33  ;;  %v803_v5 = vadd.f32 %v798_v8, %v767_v17 }
 0x119   : > { %v750_v22 = vpop.permute.xlu1 %749  ;;  %v814_v50 = vpop.permute.xlu0 %813 }
 0x11a   : > { %v768_v56 = vmul.f32 %v766_v37, %v750_v22  ;;  %v830_v0 = vmul.f32 %v828_v30, %v814_v50 }
 0x121   : > { %v764_v23 = vpop.permute.xlu2 %763 }
 0x122   : > { %v783_v24 = vpop.permute.xlu1 %782  ;;  %v771_v43 = vmul.f32 %v766_v37, %v764_v23 }
 0x123   : > { %v799_v53 = vmul.f32 %v797_v36, %v783_v24 }
 0x125   : > { %v804_v60 = vadd.f32 %v799_v53, %v768_v56 }
 0x127   : > { %v835_v7 = vadd.f32 %v830_v0, %v804_v60 }
 0x129   : > { %v849_v3 = vpop.permute.xlu0 %848 }
 0x12a   : > { %v787_v25 = vpop.permute.xlu2 %786  ;;  %v862_v12 = vmul.f32 %v859_v44, %v849_v3 }
 0x12b   : > { %v800_v61 = vmul.f32 %v797_v36, %v787_v25  ;;  %v834_v25 = vadd.f32 %v829_v18, %v803_v5 }
 0x12d   : > { %v805_v6 = vadd.f32 %v800_v61, %v769_v63 }
 0x132   : > { %v795_v28 = vpop.permute.xlu2 %794 }
 0x133   : > { %v802_v40 = vmul.f32 %v797_v36, %v795_v28 }
 0x135   : > { %v807_v47 = vadd.f32 %v802_v40, %v771_v43 }
 0x139   : > { %v760_v27 = vpop.permute.xlu1 %759 }
 0x13a   : > { %v770_v41 = vmul.f32 %v766_v37, %v760_v27 }
 0x13b   : > { %v826_v32 = vpop.permute.xlu2 %825 }
 0x13c   : > { %v833_v45 = vmul.f32 %v828_v30, %v826_v32 }
 0x13e   : > { %v838_v54 = vadd.f32 %v833_v45, %v807_v47 }
 0x142   : > { %v791_v31 = vpop.permute.xlu1 %790 }
 0x143   : > { %v801_v38 = vmul.f32 %v797_v36, %v791_v31 }
 0x144   : > { %v857_v39 = vpop.permute.xlu2 %856 }
 0x145   : > { %v806_v46 = vadd.f32 %v801_v38, %v770_v41  ;;  %v864_v48 = vmul.f32 %v859_v44, %v857_v39 }
 0x147   : > { %v869_v58 = vadd.f32 %v864_v48, %v838_v54 }
 0x149   : > { %v878_v1 = vadd.f32 %v1220_v57, %v869_v58 }
 0x14b   : > { %v822_v34 = vpop.permute.xlu1 %821  ;;  %v883_v13 = vmax.f32 %v878_v1, 0.0 }
 0x14c   : > { %v832_v42 = vmul.f32 %v828_v30, %v822_v34  ;;  %v845_v59 = vpop.permute.xlu2 %844 }
 0x14d   : > { %v861_v2 = vmul.f32 %v859_v44, %v845_v59  ;;  %v896_v19 = vrot.slane %v883_v13, 1 }
 0x14e   : > { %v837_v51 = vadd.f32 %v832_v42, %v806_v46 }
 0x14f   : > { %v866_v14 = vadd.f32 %v861_v2, %v835_v7 }
 0x151   : > { %v875_v20 = vadd.f32 %v1220_v57, %v866_v14 }
 0x153   : > { %v880_v31 = vmax.f32 %v875_v20, 0.0 }
 0x154   : > { %v853_v49 = vpop.permute.xlu1 %852 }
 0x155   : > { %v863_v52 = vmul.f32 %v859_v44, %v853_v49  ;;  %v886_v36 = vrot.slane %v880_v31, 1 }
 0x157   : > { %v868_v55 = vadd.f32 %v863_v52, %v837_v51 }
 0x159   : > { %v877_v62 = vadd.f32 %v1220_v57, %v868_v55 }
 0x15b   : > { %v882_v11 = vmax.f32 %v877_v62, 0.0 }
 0x15d   : > { %v818_v4 = vpop.permute.xlu1 %817  ;;  %v895_v10 = vrot.slane %v882_v11, 1  ;;  %v901_v22 = vmax.f32 %v882_v11, %v896_v19 }
 0x15e   : > { %v831_v9 = vmul.f32 %v828_v30, %v818_v4 }
 0x15f   : > { %v897_v27 = vsel %vm629_vm0, %v895_v10, %v896_v19  ;;  %v906_v26 = vrot.slane %v901_v22, 2 }
 0x160   : > { %v836_v15 = vadd.f32 %v831_v9, %v805_v6 }
 0x162   : > { %v867_v16 = vadd.f32 %v862_v12, %v836_v15 }
 0x164   : > { %v876_v21 = vadd.f32 %v1220_v57, %v867_v16 }
 0x166   : > { %v881_v23 = vmax.f32 %v876_v21, 0.0  ;;  %v841_v24 = vpop.permute.xlu1 %840 }
 0x167   : > { %v860_v28 = vmul.f32 %v859_v44, %v841_v24 }
 0x168   : > { %v887_v29 = vrot.slane %v881_v23, 1  ;;  %v900_v32 = vmax.f32 %v881_v23, %v897_v27 }
 0x169   : > { %v865_v34 = vadd.f32 %v860_v28, %v834_v25 }
 0x16a   : > { %v892_v33 = vmax.f32 %v880_v31, %v887_v29  ;;  %v905_v37 = vrot.slane %v900_v32, 2  ;;  %v888_v39 = vsel %vm629_vm0, %v886_v36, %v887_v29 }
 0x16b   : > { %v874_v35 = vadd.f32 %v1220_v57, %v865_v34 }
 0x16c   : > { %v911_v30 = vmax.f32 %v892_v33, %v906_v26  ;;  %v907_v41 = vsel %vm904_vm8, %v905_v37, %v906_v26 }
 0x16d   : > { %v879_v38 = vmax.f32 %v874_v35, 0.0 }
 0x16e   : > { %915 = vst.msk [vmem:[%s581_s18 + $0x8] sm:$0x1] %vm914_vm7, %v911_v30 }
 0x16f   : > { %v891_v40 = vmax.f32 %v879_v38, %v888_v39 }
 0x171   : > { %v910_v42 = vmax.f32 %v891_v40, %v907_v41 }
 0x173   : > { %913 = vst.msk [vmem:[%s581_s18] sm:$0xff] %vm912_vm9, %v910_v42 }
 0x174 PF: > { %s18_s9 = sadd.s32 1, %s1259_s9   ;;  %s1533_s3 = sld [smem:[#allocation2_spill]] }
 0x175   : > { %p15_p10 = scmp.ge.s32.totalorder %s18_s9, 20   ;;  %s1534_s10 = sld [smem:[#allocation3_spill]] }
 0x176   : > { %s1535_s27 = smov %s1251_s29  ;;  %s1536_s28 = smov %s1255_s30 }
 0x177   :  { %17 = sbr.rel (!%p15_p10) target bundleno = 3 (0x3), region = 97 }
 0x17a   : > { %s1537_s29 = smov %s1533_s3 }
 0x17b   : > { %s1538_s30 = smov %s1534_s10 }

</bundles_post_ra>
